<compile_context>
chip_gen: v7x
topology: tpu7x:2x2x1
jax: 0.10.0
libtpu: 0.0.40
codegen_flags: <defaults>
</compile_context>

<pallas_src>
import math

import jax
import jax.numpy as jnp
from jax import lax
from jax.experimental import pallas as pl
from jax.experimental.pallas import tpu as pltpu

# Fixed (non-trainable) Gaussian kernel from the module's __init__.
KERNEL_3x3 = (
    (0.03797616, 0.044863533, 0.03797616),
    (0.044863533, 0.053, 0.044863533),
    (0.03797616, 0.044863533, 0.03797616),
)
_PAD = 2  # F.conv2d(..., padding=2)

# The 3x3 kernel is (numerically) separable: K = v v^T with
#   v = [k01/sqrt(k11), sqrt(k11), k01/sqrt(k11)]
# reconstruction error per weight < 3e-10, far below f32 rounding noise.
_VB = math.sqrt(KERNEL_3x3[1][1])
_VA = KERNEL_3x3[0][1] / _VB


def _gaussian_blur_kernel(x_ref, o_ref, xp_ref):
    # x_ref : (1, 3, H, W)          channels 0..2 of one image (unpadded)
    # o_ref : (1, 3, Ho, Wo)        Ho = H + 2, Wo = W + 2
    # xp_ref: (3, H + 4, W + 4)     VMEM scratch holding the zero-padded image
    H, W = x_ref.shape[2], x_ref.shape[3]
    Ho, Wo = o_ref.shape[2], o_ref.shape[3]

    a = jnp.float32(_VA)
    b = jnp.float32(_VB)

    # Build the padding=2 halo on-chip (no HBM pre-pass). Zero the whole
    # scratch every step: it is per-core and uninitialized, and the interior
    # is overwritten anyway; the VPU work is hidden behind the DMAs.
    xp_ref[...] = jnp.zeros_like(xp_ref)
    xp_ref[:, _PAD:_PAD + H, _PAD:_PAD + W] = x_ref[0]

    # Separable 3-tap: vertical pass (sublane-offset ref slices) ...
    t = (a * (xp_ref[:, 0:Ho, :] + xp_ref[:, 2:2 + Ho, :])
         + b * xp_ref[:, 1:1 + Ho, :])                                  # (3, Ho, W+4)
    # ... then horizontal pass (only 2 lane-shifted slices).
    y = (a * (t[:, :, 0:Wo] + t[:, :, 2:2 + Wo])
         + b * t[:, :, 1:1 + Wo])                                       # (3, Ho, Wo)

    o_ref[0] = y.astype(o_ref.dtype)


def gaussian_blur(x):
    """x: (N, C>=3, H, W) -> (N, 3, H+2, W+2) float32 (GaussianBlur.forward)."""
    N, C, H, W = x.shape
    assert C >= 3, "GaussianBlur.forward reads channels 0, 1, 2"
    x = x.astype(jnp.float32)  # no-op if already float32
    Ho, Wo = H + 2 * _PAD - 3 + 1, W + 2 * _PAD - 3 + 1  # = H + 2, W + 2

    return pl.pallas_call(
        _gaussian_blur_kernel,
        out_shape=jax.ShapeDtypeStruct((N, 3, Ho, Wo), jnp.float32),
        grid=(N,),
        # Channel-dim block of 3 starting at block 0: channels >=3 are never DMA'd.
        in_specs=[pl.BlockSpec((1, 3, H, W), lambda n: (n, 0, 0, 0))],
        out_specs=pl.BlockSpec((1, 3, Ho, Wo), lambda n: (n, 0, 0, 0)),
        scratch_shapes=[pltpu.VMEM((3, H + 2 * _PAD, W + 2 * _PAD), jnp.float32)],
        compiler_params=pltpu.CompilerParams(
            dimension_semantics=("parallel",),      # batch splits across TCs (v7x)
            vmem_limit_bytes=48 * 1024 * 1024,      # headroom for larger images
        ),
    )(x)


def _reference(x):
    """Pure-JAX reference matching F.conv2d semantics (cross-correlation)."""
    x3 = x[:, :3].astype(jnp.float32)
    w = jnp.array(KERNEL_3x3, jnp.float32).reshape(1, 1, 3, 3)
    outs = []
    for c in range(3):
        xi = x3[:, c:c + 1]  # (N,1,H,W)
        yi = lax.conv_general_dilated(
            xi, w, window_strides=(1, 1),
            padding=((_PAD, _PAD), (_PAD, _PAD)),
            dimension_numbers=("NCHW", "OIHW", "NCHW"),
        )
        outs.append(yi)
    return jnp.concatenate(outs, axis=1)


if __name__ == "__main__":
    key = jax.random.PRNGKey(0)
    x = jax.random.normal(key, (2, 4, 16, 16), dtype=jnp.float32)

    out = jax.block_until_ready(gaussian_blur(x))
    ref = jax.block_until_ready(_reference(x))

    assert out.shape == (2, 3, 18, 18), out.shape
    assert jnp.allclose(out, ref, atol=1e-5, rtol=1e-5), "mismatch vs reference"

    print("KERNEL_OK")
</pallas_src>

<mosaic_0001>
module attributes {stable_mosaic.version = 11 : i64} {
  func.func @_gaussian_blur_kernel(%arg0: i32, %arg1: memref<1x3x16x16xf32, #tpu.memory_space<vmem>>, %arg2: memref<1x3x18x18xf32, #tpu.memory_space<vmem>>, %arg3: memref<3x20x20xf32, #tpu.memory_space<vmem>>) attributes {dimension_semantics = [#tpu.dimension_semantics<parallel>], iteration_bounds = array<i64: 2>, scalar_prefetch = 0 : i64, scratch_operands = 1 : i64, tpu.core_type = #tpu.core_type<tc>, window_params = [{transform_indices = @transform_0, window_bounds = array<i64: 1, 3, 16, 16>}, {transform_indices = @transform_1, window_bounds = array<i64: 1, 3, 18, 18>}]} {
    %cst = arith.constant 0.000000e+00 : f32
    %0 = vector.broadcast %cst : f32 to vector<3x20x20xf32>
    %c0 = arith.constant 0 : index
    %c0_0 = arith.constant 0 : index
    %c0_1 = arith.constant 0 : index
    %1 = vector.load %arg3[%c0, %c0_0, %c0_1] : memref<3x20x20xf32, #tpu.memory_space<vmem>>, vector<3x20x20xf32>
    tpu.vector_store %arg3[%c0, %c0_0, %c0_1], %0 {strides = array<i32>} : memref<3x20x20xf32, #tpu.memory_space<vmem>>, vector<3x20x20xf32>,
    %c0_2 = arith.constant 0 : index
    %c0_3 = arith.constant 0 : index
    %c0_4 = arith.constant 0 : index
    %c0_5 = arith.constant 0 : index
    %2 = vector.load %arg1[%c0_2, %c0_3, %c0_4, %c0_5] : memref<1x3x16x16xf32, #tpu.memory_space<vmem>>, vector<1x3x16x16xf32>
    %3 = vector.shape_cast %2 : vector<1x3x16x16xf32> to vector<3x16x16xf32>
    %c0_6 = arith.constant 0 : index
    %c2 = arith.constant 2 : index
    %c2_7 = arith.constant 2 : index
    %4 = vector.load %arg3[%c0_6, %c2, %c2_7] : memref<3x20x20xf32, #tpu.memory_space<vmem>>, vector<3x16x16xf32>
    tpu.vector_store %arg3[%c0_6, %c2, %c2_7], %3 {strides = array<i32>} : memref<3x20x20xf32, #tpu.memory_space<vmem>>, vector<3x16x16xf32>,
    %c0_8 = arith.constant 0 : index
    %c0_9 = arith.constant 0 : index
    %c0_10 = arith.constant 0 : index
    %5 = vector.load %arg3[%c0_8, %c0_9, %c0_10] : memref<3x20x20xf32, #tpu.memory_space<vmem>>, vector<3x18x20xf32>
    %c0_11 = arith.constant 0 : index
    %c2_12 = arith.constant 2 : index
    %c0_13 = arith.constant 0 : index
    %6 = vector.load %arg3[%c0_11, %c2_12, %c0_13] : memref<3x20x20xf32, #tpu.memory_space<vmem>>, vector<3x18x20xf32>
    %7 = arith.addf %5, %6 : vector<3x18x20xf32>
    %cst_14 = arith.constant 0.194874734 : f32
    %8 = vector.broadcast %cst_14 : f32 to vector<3x18x20xf32>
    %9 = arith.mulf %8, %7 : vector<3x18x20xf32>
    %c0_15 = arith.constant 0 : index
    %c1 = arith.constant 1 : index
    %c0_16 = arith.constant 0 : index
    %10 = vector.load %arg3[%c0_15, %c1, %c0_16] : memref<3x20x20xf32, #tpu.memory_space<vmem>>, vector<3x18x20xf32>
    %cst_17 = arith.constant 0.230217293 : f32
    %11 = vector.broadcast %cst_17 : f32 to vector<3x18x20xf32>
    %12 = arith.mulf %11, %10 : vector<3x18x20xf32>
    %13 = arith.addf %9, %12 : vector<3x18x20xf32>
    %14 = vector.extract_strided_slice %13 {offsets = [0, 0, 0], sizes = [3, 18, 18], strides = [1, 1, 1]} : vector<3x18x20xf32> to vector<3x18x18xf32>
    %15 = vector.extract_strided_slice %13 {offsets = [0, 0, 2], sizes = [3, 18, 18], strides = [1, 1, 1]} : vector<3x18x20xf32> to vector<3x18x18xf32>
    %16 = arith.addf %14, %15 : vector<3x18x18xf32>
    %cst_18 = arith.constant 0.194874734 : f32
    %17 = vector.broadcast %cst_18 : f32 to vector<3x18x18xf32>
    %18 = arith.mulf %17, %16 : vector<3x18x18xf32>
    %19 = vector.extract_strided_slice %13 {offsets = [0, 0, 1], sizes = [3, 18, 18], strides = [1, 1, 1]} : vector<3x18x20xf32> to vector<3x18x18xf32>
    %cst_19 = arith.constant 0.230217293 : f32
    %20 = vector.broadcast %cst_19 : f32 to vector<3x18x18xf32>
    %21 = arith.mulf %20, %19 : vector<3x18x18xf32>
    %22 = arith.addf %18, %21 : vector<3x18x18xf32>
    %c0_20 = arith.constant 0 : index
    %c0_21 = arith.constant 0 : index
    %c0_22 = arith.constant 0 : index
    %c0_23 = arith.constant 0 : index
    %23 = vector.load %arg2[%c0_20, %c0_21, %c0_22, %c0_23] : memref<1x3x18x18xf32, #tpu.memory_space<vmem>>, vector<1x3x18x18xf32>
    %24 = vector.shape_cast %23 : vector<1x3x18x18xf32> to vector<3x18x18xf32>
    %25 = vector.shape_cast %22 : vector<3x18x18xf32> to vector<1x3x18x18xf32>
    tpu.vector_store %arg2[%c0_20, %c0_21, %c0_22, %c0_23], %25 {strides = array<i32>} : memref<1x3x18x18xf32, #tpu.memory_space<vmem>>, vector<1x3x18x18xf32>,
    return
  }
  func.func @transform_0(%arg0: i32) -> (i32, i32, i32, i32) {
    %c0_i32 = arith.constant 0 : i32
    %c0_i32_0 = arith.constant 0 : i32
    %c0_i32_1 = arith.constant 0 : i32
    %c0_i32_2 = arith.constant 0 : i32
    return %arg0, %c0_i32, %c0_i32_0, %c0_i32_1 : i32, i32, i32, i32
  }
  func.func @transform_1(%arg0: i32) -> (i32, i32, i32, i32) {
    %c0_i32 = arith.constant 0 : i32
    %c0_i32_0 = arith.constant 0 : i32
    %c0_i32_1 = arith.constant 0 : i32
    %c0_i32_2 = arith.constant 0 : i32
    return %arg0, %c0_i32, %c0_i32_0, %c0_i32_1 : i32, i32, i32, i32
  }
}

</mosaic_0001>

<bundles_post_ra>
// kernel: tpu_custom_call.1
= control target key start
LH: loop header
LB: loop body
LE: loop exit
PB: predicated region body
PF: predicated region fallthrough
CT: control target
= control target key end

     0   :  { %6 = vsyncpa [#allocation4], 0  ;;  %s737_s0 = inlined_call_operand.hbm [shape: f32[2,4,16,16], index: 0, kind: input, shape index: {}]   ;;  %s738_s1 = inlined_call_operand.vmem [shape: f32[2,3,18,18], index: 1, kind: output, shape index: {}]  }
   0x1   :  { %8 = vsyncpa [#allocation4 + $0x1], 0  ;;  %s575_s6 = smov 0   ;;  %s577_s7 = smov 0  }
   0x2   :  { %s579_s8 = smov 0   ;;  %s581_s9 = smov 0  }
   0x3 LB: > { %s594_s10 = sadd.s32 4294967295, %s556_s9   ;;  %s597_s11 = sadd.s32 1, %s556_s9   ;;  %s556_s9 = sphi %s581_s9, %s745_s9   ;;  %s552_s8 = sphi %s579_s8, %s744_s8   ;;  %s548_s7 = sphi %s577_s7, %s743_s7   ;;  %s544_s6 = sphi %s575_s6, %s742_s6  }
   0x4   : > { %s18_s12 = ssub.s32 %s556_s9, %s597_s11  ;;  %s21_s13 = sadd.s32 1, %s552_s8 }
   0x5   : > { %p19_p0 = scmp.eq.s32.totalorder %s18_s12, 0  ;;  %p28_p1 = scmp.ne.s32.totalorder %s552_s8, %s548_s7 }
   0x6   : > { %p29_p2 = scmp.eq.s32.totalorder %s556_s9, 0  ;;  %p34_p3 = scmp.ne.s32.totalorder %s548_s7, %s544_s6 }
   0x7   : > { %s607_s14 = scalar_select %p19_p0, %s552_s8, %s21_s13  }
   0x8   : > { %p30_p4 = por %p29_p2, %p28_p1  ;;  %p35_p5 = scmp.eq.s32.totalorder %s594_s10, 0 }
   0x9   : > { %p453_p6 = scmp.lt.s32.totalorder %s556_s9, 2  ;;  %s84_s16 = sand.u32 1, %s552_s8  }
   0xa   : > { %p611_p7 = por %p35_p5, %p34_p3  ;;  %s444_s17 = smul.u32 48, %s84_s16 }
   0xb   : > { %s443_s18 = sshll.u32 %s556_s9, 10  ;;  %p617_p8 = pnand %p453_p6, %p30_p4 }
   0xc   : > { %s624_s22 = scalar_lea.hbm %s737_s0, %s443_s18  ;;  %s88_s23 = scalar_lea.vmem [#allocation3], %s444_s17 }
   0xd   : > { %s95_s24 = sshll.u32 %s88_s23, 4  ;;  %s629_s25 = scalar_lea.sflag [#allocation4], %s84_s16  ;;  %s626_s24 = int_to_ptr.vmem [resolvable:$true] %s95_s24 }
   0xe   : > { %s492_s26 = scalar_lea.hbm %s624_s22, 768  ;;  %p494_p11 = pneg %p617_p8 }
   0xf   : > { %p493_p10 = scmp.ne.s32.totalorder %s624_s22, %s492_s26  ;;  %s497_s29 = scalar_lea.hbm %s737_s0, 2048 }
  0x10   : > { %p498_p0 = scmp.lt.u32.totalorder %s624_s22, %s737_s0  ;;  %p499_p1 = scmp.lt.u32.totalorder %s497_s29, %s492_s26 }
  0x11   : > { %p495_p12 = pnand %p494_p11, %p493_p10  ;;  %p501_p3 = scmp.lt.u32.totalorder %s492_s26, %s624_s22 }
  0x12   : > { %p500_p2 = por %p499_p1, %p498_p0 }
  0x13   : > { %p496_p13 = pneg %p495_p12 }
  0x14   : > { %p502_p4 = por %p501_p3, %p500_p2 }
  0x16   : > { %p503_p5 = pnand %p502_p4, %p496_p13 }
  0x18   : > { %506 = shalt.err (!%p503_p5)
}
  0x19   : > { %s507_s3 = scalar_lea.vmem %s626_s24, 768  ;;  %s558_s4 = smov [#allocation3]  }
  0x1a   : > { %p508_p6 = scmp.ne.s32.totalorder %s626_s24, %s507_s3  ;;  %s512_s5 = sshll.u32 %s558_s4, 4  ;;  %s513_s5 = int_to_ptr.vmem [resolvable:$false] %s512_s5 }
  0x1b   : > { %s514_s6 = scalar_lea.vmem %s513_s5, 1536  ;;  %p515_p9 = scmp.lt.s32.totalorder %s626_s24, %s513_s5 }
  0x1c   : > { %p510_p10 = pnand %p508_p6, %p494_p11  ;;  %p516_p0 = scmp.lt.s32.totalorder %s514_s6, %s507_s3 }
  0x1e   : > { %p511_p12 = pneg %p510_p10  ;;  %p517_p1 = por %p516_p0, %p515_p9 }
  0x20   : > { %p518_p2 = pnand %p517_p1, %p511_p12 }
  0x22   : > { %521 = shalt.err (!%p518_p2)
}
  0x23   : > { %s559_s12 = smov 128   ;;  %s560_s13 = smov 8  }
  0x24   : > { %452 = dma.hbm_to_vmem [thread:$0]  (!%p617_p8), %s624_s22, 768, %s626_s24, %s629_s25, %s559_s12, %s559_s12, %s560_s13  }
  0x25   : > { %p103_p11 = scmp.lt.s32.totalorder %s556_s9, 3  ;;  %p741_p13 = scmp.ge.s32.totalorder %s556_s9, 1 }
  0x27   : > { %p104_p3 = pnand %p741_p13, %p103_p11 }
  0x28   : > { %s109_s16 = sand.u32 (!%p104_p3), 1, %s548_s7  }
  0x29   : > { %107 = sbr.rel (%p104_p3) target bundleno = 335 (0x14f), region = 24  ;;  %s110_s18 = scalar_lea.sflag (!%p104_p3), [#allocation4], %s109_s16 }
  0x2a   : > { %s445_s17 = smul.u32 (!%p104_p3), 48, %s109_s16 }
  0x2c   : > { %s113_s20 = scalar_lea.vmem (!%p104_p3), [#allocation3], %s445_s17 }
  0x30   : > { %539 = dma.done.wait (%p611_p7), %s110_s18, 768  }
  0x31   : > { %541 = vsyncadd (%p611_p7), %s110_s18, 4294966528  ;;  %vm137_vm0 = vcmask 162816   ;;  %vm140_vm1 = vcmask 158720   ;;  %v561_v0 = vmov 0.0   ;;  %v148_v1 = vld [vmem:[%s113_s20] sm:$0xff]  ;;  %v150_v2 = vld [vmem:[%s113_s20 + $0x10] sm:$0xff] }
  0x32   : > { %138 = vst.msk [vmem:[#allocation2] sm:$0xff] %vm137_vm0, %v561_v0  ;;  %139 = vst.msk [vmem:[#allocation2 + $0x8] sm:$0xff] %vm137_vm0, %v561_v0  ;;  %s562_s9 = smov 2   ;;  %v149_v3 = vld [vmem:[%s113_s20 + $0x8] sm:$0xff]  ;;  %v151_v4 = vld [vmem:[%s113_s20 + $0x18] sm:$0xff]  ;;  %vm178_vm2 = vcmask 146448  }
  0x33   : > { %142 = vst.msk [vmem:[#allocation2 + $0x18] sm:$0xff] %vm137_vm0, %v561_v0  ;;  %143 = vst.msk [vmem:[#allocation2 + $0x20] sm:$0xff] %vm137_vm0, %v561_v0  ;;  %160 = vrot.lane.b32.xlu0 %v148_v1, %s562_s9  ;;  %164 = vrot.lane.b32.xlu1 %v150_v2, %s562_s9  ;;  %v152_v5 = vld [vmem:[%s113_s20 + $0x20] sm:$0xff]  ;;  %v153_v6 = vld [vmem:[%s113_s20 + $0x28] sm:$0xff]  ;;  %s563_s15 = smov 126   ;;  %s564_s19 = smov 127  }
  0x34   : > { %145 = vst.msk [vmem:[#allocation2 + $0x30] sm:$0xff] %vm137_vm0, %v561_v0  ;;  %146 = vst.msk [vmem:[#allocation2 + $0x38] sm:$0xff] %vm137_vm0, %v561_v0  ;;  %p132_p7 = scmp.lt.s32.totalorder %s594_s10, 1  ;;  %vm356_vm3 = vcmask 146432   ;;  %vm359_vm4 = vcmask 140288  }
  0x35   : > { %141 = vst.msk [vmem:[#allocation2 + $0x10] sm:$0xf] %vm140_vm1, %v561_v0  ;;  %144 = vst.msk [vmem:[#allocation2 + $0x28] sm:$0xf] %vm140_vm1, %v561_v0 }
  0x36   : > { %147 = vst.msk [vmem:[#allocation2 + $0x40] sm:$0xf] %vm140_vm1, %v561_v0  ;;  %s747_s10 = smov (!%p132_p7, %s594_s10), 1 }
  0x37   : > { %162 = vrot.lane.b32.xlu0 %v149_v3, %s562_s9  ;;  %166 = vrot.lane.b32.xlu1 %v151_v4, %s562_s9  ;;  %s446_s21 = smul.u32 72, %s747_s10 }
  0x39   : > { %s702_s24 = scalar_lea.vmem %s738_s1, %s446_s21 }
  0x3b   : > { %168 = vrot.lane.b32.xlu0 %v152_v5, %s562_s9  ;;  %170 = vrot.lane.b32.xlu1 %v153_v6, %s562_s9 }
  0x3c   : > { %v196_v23 = vld [vmem:[#allocation2 + $0x12] sm:$0x3]  ;;  %v199_v27 = vld [vmem:[#allocation2 + $0x2a] sm:$0x3] }
  0x3d   : > { %v202_v57 = vld [vmem:[#allocation2 + $0x42] sm:$0x3] }
  0xa5   : > { %v161_v7 = vpop.permute.xlu0 %160  ;;  %v165_v8 = vpop.permute.xlu1 %164 }
  0xa6   : > { %179 = vst.msk [vmem:[#allocation2 + $0x2] sm:$0xff] %vm178_vm2, %v161_v7  ;;  %181 = vst.msk [vmem:[#allocation2 + $0x1a] sm:$0xff] %vm178_vm2, %v165_v8 }
  0xa9   : > { %v163_v9 = vpop.permute.xlu0 %162  ;;  %v167_v10 = vpop.permute.xlu1 %166 }
  0xaa   : > { %180 = vst.msk [vmem:[#allocation2 + $0xa] sm:$0xff] %vm178_vm2, %v163_v9  ;;  %182 = vst.msk [vmem:[#allocation2 + $0x22] sm:$0xff] %vm178_vm2, %v167_v10 }
  0xad   : > { %v169_v11 = vpop.permute.xlu0 %168  ;;  %v171_v12 = vpop.permute.xlu1 %170  ;;  %v185_v13 = vld [vmem:[#allocation2] sm:$0xff]  ;;  %v188_v17 = vld [vmem:[#allocation2 + $0x18] sm:$0xff] }
  0xae   : > { %v194_v14 = vld [vmem:[#allocation2 + $0x2] sm:$0xff]  ;;  %183 = vst.msk [vmem:[#allocation2 + $0x32] sm:$0xff] %vm178_vm2, %v169_v11  ;;  %184 = vst.msk [vmem:[#allocation2 + $0x3a] sm:$0xff] %vm178_vm2, %v171_v12  ;;  %v197_v18 = vld [vmem:[#allocation2 + $0x1a] sm:$0xff] }
  0xaf   : > { %v221_v15 = vld [vmem:[#allocation2 + $0x1] sm:$0xff]  ;;  %v203_v16 = vadd.f32 %v194_v14, %v185_v13  ;;  %v206_v19 = vadd.f32 %v197_v18, %v188_v17  ;;  %v224_v20 = vld [vmem:[#allocation2 + $0x19] sm:$0xff] }
  0xb0   : > { %v230_v22 = vmul.f32 0.2302173, %v221_v15  ;;  %v233_v32 = vmul.f32 0.2302173, %v224_v20 }
  0xb1   : > { %v212_v21 = vmul.f32 0.19487473, %v203_v16  ;;  %v186_v24 = vld [vmem:[#allocation2 + $0x8] sm:$0xff]  ;;  %v187_v30 = vld [vmem:[#allocation2 + $0x10] sm:$0x3]  ;;  %v189_v35 = vld [vmem:[#allocation2 + $0x20] sm:$0xff] }
  0xb2   : > { %v195_v25 = vld [vmem:[#allocation2 + $0xa] sm:$0xff]  ;;  %v205_v33 = vadd.f32 %v196_v23, %v187_v30  ;;  %v215_v34 = vmul.f32 0.19487473, %v206_v19  ;;  %v198_v36 = vld [vmem:[#allocation2 + $0x22] sm:$0xff] }
  0xb3   : > { %v222_v26 = vld [vmem:[#allocation2 + $0x9] sm:$0xff]  ;;  %v665_v28 = vadd.f32 %v230_v22, %v212_v21  ;;  %v204_v29 = vadd.f32 %v195_v25, %v186_v24  ;;  %v223_v31 = vld [vmem:[#allocation2 + $0x11] sm:$0x3]  ;;  %v225_v37 = vld [vmem:[#allocation2 + $0x21] sm:$0xff]  ;;  %v207_v40 = vadd.f32 %v198_v36, %v189_v35 }
  0xb4   : > { %v231_v39 = vmul.f32 0.2302173, %v222_v26  ;;  %v190_v41 = vld [vmem:[#allocation2 + $0x28] sm:$0x3]  ;;  %v214_v42 = vmul.f32 0.19487473, %v205_v33  ;;  %v242_v60 = vadd.f32 %v233_v32, %v215_v34 }
  0xb5   : > { %257 = vrot.lane.b32.xlu0 %v665_v28, %s563_s15  ;;  %v213_v38 = vmul.f32 0.19487473, %v204_v29  ;;  %v232_v43 = vmul.f32 0.2302173, %v223_v31  ;;  %v191_v44 = vld [vmem:[#allocation2 + $0x30] sm:$0xff]  ;;  %v208_v48 = vadd.f32 %v199_v27, %v190_v41  ;;  %v192_v54 = vld [vmem:[#allocation2 + $0x38] sm:$0xff] }
  0xb6   : > { %v200_v45 = vld [vmem:[#allocation2 + $0x32] sm:$0xff]  ;;  %v234_v47 = vmul.f32 0.2302173, %v225_v37  ;;  %v216_v52 = vmul.f32 0.19487473, %v207_v40  ;;  %v201_v55 = vld [vmem:[#allocation2 + $0x3a] sm:$0xff] }
  0xb7   : > { %v669_v46 = vadd.f32 %v231_v39, %v213_v38  ;;  %v209_v49 = vadd.f32 %v200_v45, %v191_v44  ;;  %v227_v50 = vld [vmem:[#allocation2 + $0x31] sm:$0xff]  ;;  %v671_v51 = vadd.f32 %v232_v43, %v214_v42  ;;  %v226_v53 = vld [vmem:[#allocation2 + $0x29] sm:$0x3]  ;;  %v193_v56 = vld [vmem:[#allocation2 + $0x40] sm:$0x3]  ;;  %v210_v63 = vadd.f32 %v201_v55, %v192_v54 }
  0xb8   : > { %v236_v59 = vmul.f32 0.2302173, %v227_v50  ;;  %v217_v61 = vmul.f32 0.19487473, %v208_v48  ;;  %v235_v62 = vmul.f32 0.2302173, %v226_v53  ;;  %v243_v0 = vadd.f32 %v234_v47, %v216_v52 }
  0xb9   : > { %259 = vrot.lane.b32.xlu1 %v669_v46, %s563_s15  ;;  %261 = vrot.lane.b32.xlu0 %v671_v51, %s563_s15  ;;  %v218_v58 = vmul.f32 0.19487473, %v209_v49  ;;  %v228_v1 = vld [vmem:[#allocation2 + $0x39] sm:$0xff]  ;;  %v211_v2 = vadd.f32 %v202_v57, %v193_v56  ;;  %v229_v3 = vld [vmem:[#allocation2 + $0x41] sm:$0x3] }
  0xba   : > { %v244_v5 = vadd.f32 %v235_v62, %v217_v61  ;;  %v219_v6 = vmul.f32 0.19487473, %v210_v63  ;;  %v237_v7 = vmul.f32 0.2302173, %v228_v1  ;;  %v238_v9 = vmul.f32 0.2302173, %v229_v3 }
  0xbb   : > { %v679_v4 = vadd.f32 %v236_v59, %v218_v58  ;;  %v220_v8 = vmul.f32 0.19487473, %v211_v2  ;;  %v302_v12 = vmul.f32 0.2302173, %v665_v28  ;;  %v303_v13 = vmul.f32 0.2302173, %v669_v46 }
  0xbc   : > { %v246_v10 = vadd.f32 %v237_v7, %v219_v6  ;;  %v304_v14 = vmul.f32 0.2302173, %v671_v51  ;;  %v305_v15 = vmul.f32 0.2302173, %v242_v60  ;;  %v306_v16 = vmul.f32 0.2302173, %v243_v0 }
  0xbd   : > { %263 = vrot.lane.b32.xlu1 %v242_v60, %s563_s15  ;;  %265 = vrot.lane.b32.xlu0 %v243_v0, %s563_s15  ;;  %v684_v11 = vadd.f32 %v238_v9, %v220_v8  ;;  %v307_v17 = vmul.f32 0.2302173, %v244_v5  ;;  %v308_v18 = vmul.f32 0.2302173, %v679_v4 }
  0xbe   : > { %v309_v19 = vmul.f32 0.2302173, %v246_v10 }
  0xbf   : > { %v310_v20 = vmul.f32 0.2302173, %v684_v11 }
  0xc1   : > { %267 = vrot.lane.b32.xlu1 %v244_v5, %s563_s15  ;;  %269 = vrot.lane.b32.xlu0 %v679_v4, %s563_s15 }
  0xc5   : > { %271 = vrot.lane.b32.xlu1 %v246_v10, %s563_s15  ;;  %273 = vrot.lane.b32.xlu0 %v684_v11, %s563_s15 }
  0xc9   : > { %320 = vrot.lane.b32.xlu1 %v302_v12, %s564_s19  ;;  %322 = vrot.lane.b32.xlu0 %v303_v13, %s564_s19 }
  0xcd   : > { %324 = vrot.lane.b32.xlu1 %v304_v14, %s564_s19  ;;  %326 = vrot.lane.b32.xlu0 %v305_v15, %s564_s19 }
  0xd1   : > { %328 = vrot.lane.b32.xlu1 %v306_v16, %s564_s19  ;;  %330 = vrot.lane.b32.xlu0 %v307_v17, %s564_s19 }
  0xd5   : > { %332 = vrot.lane.b32.xlu1 %v308_v18, %s564_s19  ;;  %334 = vrot.lane.b32.xlu0 %v309_v19, %s564_s19 }
  0xd9   : > { %336 = vrot.lane.b32.xlu1 %v310_v20, %s564_s19 }
 0x127   : > { %v258_v21 = vpop.permute.xlu0 %257 }
 0x128   : > { %v284_v29 = vadd.f32 %v258_v21, %v665_v28 }
 0x12a   : > { %v293_v33 = vmul.f32 0.19487473, %v284_v29 }
 0x12b   : > { %v260_v22 = vpop.permute.xlu1 %259  ;;  %v262_v23 = vpop.permute.xlu0 %261 }
 0x12c   : > { %v285_v30 = vadd.f32 %v260_v22, %v669_v46  ;;  %v286_v34 = vadd.f32 %v262_v23, %v671_v51 }
 0x12e   : > { %v294_v35 = vmul.f32 0.19487473, %v285_v30  ;;  %v295_v40 = vmul.f32 0.19487473, %v286_v34 }
 0x12f   : > { %v264_v24 = vpop.permute.xlu1 %263  ;;  %v266_v25 = vpop.permute.xlu0 %265 }
 0x130   : > { %v287_v36 = vadd.f32 %v264_v24, %v242_v60  ;;  %v288_v41 = vadd.f32 %v266_v25, %v243_v0 }
 0x132   : > { %v296_v42 = vmul.f32 0.19487473, %v287_v36  ;;  %v297_v48 = vmul.f32 0.19487473, %v288_v41 }
 0x133   : > { %v268_v26 = vpop.permute.xlu1 %267  ;;  %v270_v27 = vpop.permute.xlu0 %269 }
 0x134   : > { %v289_v43 = vadd.f32 %v268_v26, %v244_v5  ;;  %v290_v49 = vadd.f32 %v270_v27, %v679_v4 }
 0x136   : > { %v298_v50 = vmul.f32 0.19487473, %v289_v43  ;;  %v299_v56 = vmul.f32 0.19487473, %v290_v49 }
 0x137   : > { %v272_v31 = vpop.permute.xlu1 %271  ;;  %v274_v32 = vpop.permute.xlu0 %273 }
 0x138   : > { %v291_v51 = vadd.f32 %v272_v31, %v246_v10  ;;  %v292_v57 = vadd.f32 %v274_v32, %v684_v11 }
 0x13a   : > { %v300_v58 = vmul.f32 0.19487473, %v291_v51  ;;  %v301_v63 = vmul.f32 0.19487473, %v292_v57 }
 0x13b   : > { %v321_v37 = vpop.permute.xlu1 %320  ;;  %v323_v28 = vpop.permute.xlu0 %322 }
 0x13c   : > { %v347_v38 = vadd.f32 %v321_v37, %v293_v33  ;;  %v348_v39 = vadd.f32 %v323_v28, %v294_v35 }
 0x13e   : > { %357 = vst.msk [vmem:[%s702_s24] sm:$0xff] %vm356_vm3, %v347_v38  ;;  %358 = vst.msk [vmem:[%s702_s24 + $0x8] sm:$0xff] %vm356_vm3, %v348_v39 }
 0x13f   : > { %v325_v44 = vpop.permute.xlu1 %324  ;;  %v327_v45 = vpop.permute.xlu0 %326 }
 0x140   : > { %v349_v46 = vadd.f32 %v325_v44, %v295_v40  ;;  %v350_v47 = vadd.f32 %v327_v45, %v296_v42 }
 0x142   : > { %360 = vst.msk [vmem:[%s702_s24 + $0x10] sm:$0x3] %vm359_vm4, %v349_v46 }
 0x143   : > { %361 = vst.msk [vmem:[%s702_s24 + $0x18] sm:$0xff] %vm356_vm3, %v350_v47  ;;  %v329_v52 = vpop.permute.xlu1 %328  ;;  %v331_v53 = vpop.permute.xlu0 %330 }
 0x144   : > { %v351_v54 = vadd.f32 %v329_v52, %v297_v48  ;;  %v352_v55 = vadd.f32 %v331_v53, %v298_v50 }
 0x146   : > { %362 = vst.msk [vmem:[%s702_s24 + $0x20] sm:$0xff] %vm356_vm3, %v351_v54 }
 0x147   : > { %363 = vst.msk [vmem:[%s702_s24 + $0x28] sm:$0x3] %vm359_vm4, %v352_v55  ;;  %v333_v59 = vpop.permute.xlu1 %332  ;;  %v335_v60 = vpop.permute.xlu0 %334 }
 0x148   : > { %v353_v61 = vadd.f32 %v333_v59, %v299_v56  ;;  %v354_v62 = vadd.f32 %v335_v60, %v300_v58 }
 0x14a   : > { %364 = vst.msk [vmem:[%s702_s24 + $0x30] sm:$0xff] %vm356_vm3, %v353_v61  ;;  %365 = vst.msk [vmem:[%s702_s24 + $0x38] sm:$0xff] %vm356_vm3, %v354_v62 }
 0x14b   : > { %v337_v0 = vpop.permute.xlu1 %336 }
 0x14c   : > { %v355_v1 = vadd.f32 %v337_v0, %v301_v63 }
 0x14e   : > { %366 = vst.msk [vmem:[%s702_s24 + $0x40] sm:$0x3] %vm359_vm4, %v355_v1 }
 0x14f PF: > { %p11_p8 = scmp.ge.s32.totalorder %s597_s11, 4   ;;  %s742_s6 = smov %s548_s7 }
 0x150   : > { %s743_s7 = smov %s552_s8  ;;  %s744_s8 = smov %s607_s14 }
 0x151   : > { %s745_s9 = smov %s597_s11  ;;  %13 = sbr.rel (!%p11_p8) target bundleno = 3 (0x3), region = 64 }
 0x158   :  { %388 = vsyncpa [#allocation4], 1 }
 0x159   :  { %390 = vsyncpa [#allocation4 + $0x1], 1 }

</bundles_post_ra>
